<compile_context>
chip_gen: v6e
topology: v6e:2x2x1
jax: 0.10.0
libtpu: 0.0.40
codegen_flags: <defaults>
</compile_context>

<pallas_src>
import functools

import jax
import jax.numpy as jnp
from jax.experimental import pallas as pl
from jax.experimental.pallas import tpu as pltpu


def _ce_label_smooth_kernel(logits_ref, targets_ref, loss_ref,
                            m_sc, l_sc, s_sc, xt_sc, *,
                            epsilon, num_classes, tk):
    """Label-smoothed CE over one (TB, TK) logits tile with online logsumexp.

    Grid: (num_batch_tiles, num_class_tiles); class axis innermost ("arbitrary").
      logits_ref:  (TB, TK) input dtype (f32 or bf16)
      targets_ref: (TB, 1)  int32
      loss_ref:    (TB, 1)  f32 per-sample loss (written on last class tile)
      scratch:     m/l/s/xt (TB, 1) f32 = running max / exp-sum / sum(x) / x[target]
    """
    k = pl.program_id(1)          # class tile
    nk = pl.num_programs(1)

    @pl.when(k == 0)
    def _init():
        m_sc[...] = jnp.full_like(m_sc, -jnp.inf)
        l_sc[...] = jnp.zeros_like(l_sc)
        s_sc[...] = jnp.zeros_like(s_sc)
        xt_sc[...] = jnp.zeros_like(xt_sc)

    x = logits_ref[...].astype(jnp.float32)                       # (TB, TK)
    # Scalar-side tile offset: compare against a *local* iota (no per-element add).
    tgt_local = targets_ref[...] - k * tk                         # (TB, 1)
    col_iota = jax.lax.broadcasted_iota(jnp.int32, x.shape, 1)    # local class ids

    def _accumulate(x_lse, x_sum):
        # Online logsumexp update.
        m_prev = m_sc[...]
        m_new = jnp.maximum(m_prev, jnp.max(x_lse, axis=1, keepdims=True))
        alpha = jnp.exp(m_prev - m_new)
        p = jnp.exp(x_lse - m_new)                                # 0 for masked cols
        l_sc[...] = alpha * l_sc[...] + jnp.sum(p, axis=1, keepdims=True)
        m_sc[...] = m_new
        # Running sum_k x[i,k] (uniform-smoothing term) and gathered x[i, t_i].
        s_sc[...] += jnp.sum(x_sum, axis=1, keepdims=True)
        xt_sc[...] += jnp.sum(jnp.where(col_iota == tgt_local, x_sum, 0.0),
                              axis=1, keepdims=True)

    tail_k = num_classes % tk
    if tail_k == 0:
        # Every class tile is full: mask-free fast path on all grid steps.
        _accumulate(x, x)
    else:
        @pl.when(k < nk - 1)
        def _fast():
            _accumulate(x, x)

        @pl.when(k == nk - 1)
        def _ragged_tail():
            col_valid = col_iota < tail_k
            _accumulate(jnp.where(col_valid, x, -jnp.inf),
                        jnp.where(col_valid, x, 0.0))

    @pl.when(k == nk - 1)
    def _finalize():
        lse = m_sc[...] + jnp.log(l_sc[...])                      # (TB, 1)
        loss_ref[...] = (lse
                         - (1.0 - epsilon) * xt_sc[...]
                         - (epsilon / num_classes) * s_sc[...])


def cross_entropy_label_smooth(logits, targets, *, epsilon=0.1, reduction=True,
                               block_b=None, block_k=None):
    """JAX/Pallas equivalent of CrossEntropyLabelSmooth.forward.

    logits:  (batch, num_classes) float array (f32 or bf16 accepted)
    targets: (batch,) integer class indices
    """
    batch, num_classes = logits.shape
    targets2d = targets.astype(jnp.int32).reshape(batch, 1)

    # Generation-safe defaults: 256 x 2048 double-buffered input + f32 temporaries
    # stay well under v7x's 64 MiB VMEM while amortizing per-grid-step overhead on
    # v5e/v6e.  block_b should be a multiple of 8 (or >= batch) when overridden.
    if block_b is None:
        block_b = 256
    if block_k is None:
        block_k = 2048
    tb = int(min(block_b, batch))
    tk = int(min(block_k, num_classes))

    nb = pl.cdiv(batch, tb)
    nk = pl.cdiv(num_classes, tk)

    kernel = functools.partial(
        _ce_label_smooth_kernel,
        epsilon=float(epsilon), num_classes=int(num_classes), tk=tk)

    grid_spec = pltpu.PrefetchScalarGridSpec(
        num_scalar_prefetch=0,
        grid=(nb, nk),
        in_specs=[
            pl.BlockSpec((tb, tk), lambda i, k: (i, k)),
            pl.BlockSpec((tb, 1), lambda i, k: (i, 0)),
        ],
        out_specs=pl.BlockSpec((tb, 1), lambda i, k: (i, 0)),
        scratch_shapes=[
            pltpu.VMEM((tb, 1), jnp.float32),   # running max
            pltpu.VMEM((tb, 1), jnp.float32),   # running sum of exp
            pltpu.VMEM((tb, 1), jnp.float32),   # running sum of logits
            pltpu.VMEM((tb, 1), jnp.float32),   # gathered x[target]
        ],
    )

    per_sample = pl.pallas_call(
        kernel,
        out_shape=jax.ShapeDtypeStruct((batch, 1), jnp.float32),
        grid_spec=grid_spec,
        compiler_params=pltpu.CompilerParams(
            # Batch tiles are independent -> megacore-friendly on v7x.
            dimension_semantics=("parallel", "arbitrary"),
            # < v7x's 64 MiB physical VMEM; ample on v5e/v6e (128 MiB).
            vmem_limit_bytes=48 * 1024 * 1024,
        ),
    )(logits, targets2d)

    loss = per_sample[:, 0]
    if reduction:
        # Tiny (batch,) reduction; doing it in XLA keeps the grid batch-parallel.
        return jnp.mean(loss)
    return loss


def _reference(logits, targets, epsilon=0.1, reduction=True):
    """Pure-JAX reference matching the PyTorch module."""
    num_classes = logits.shape[1]
    log_probs = jax.nn.log_softmax(logits.astype(jnp.float32), axis=1)
    one_hot = jax.nn.one_hot(targets, num_classes, dtype=jnp.float32)
    smoothed = (1.0 - epsilon) * one_hot + epsilon / num_classes
    loss = jnp.sum(-smoothed * log_probs, axis=1)
    return jnp.mean(loss) if reduction else loss


if __name__ == "__main__":
    key = jax.random.PRNGKey(0)
    k_logits, k_targets, k_logits2, k_targets2 = jax.random.split(key, 4)

    # Small, module-consistent shapes (single tile, fast path only).
    batch, num_classes = 8, 32
    logits = jax.random.normal(k_logits, (batch, num_classes), dtype=jnp.float32)
    targets = jax.random.randint(k_targets, (batch,), 0, num_classes, dtype=jnp.int32)

    out_mean = jax.block_until_ready(
        cross_entropy_label_smooth(logits, targets, epsilon=0.1, reduction=True))
    ref_mean = _reference(logits, targets, 0.1, True)
    assert jnp.allclose(out_mean, ref_mean, rtol=1e-5, atol=1e-5), (out_mean, ref_mean)

    out_vec = jax.block_until_ready(
        cross_entropy_label_smooth(logits, targets, epsilon=0.1, reduction=False))
    ref_vec = _reference(logits, targets, 0.1, False)
    assert jnp.allclose(out_vec, ref_vec, rtol=1e-5, atol=1e-5), (out_vec, ref_vec)

    # Multi-tile grid with ragged batch (20 % 8) and ragged class tail (300 % 128):
    # exercises the masked last-class-tile path and partial output stores.
    b2, c2 = 20, 300
    logits2 = jax.random.normal(k_logits2, (b2, c2), dtype=jnp.float32)
    targets2 = jax.random.randint(k_targets2, (b2,), 0, c2, dtype=jnp.int32)

    out2 = jax.block_until_ready(
        cross_entropy_label_smooth(logits2, targets2, epsilon=0.1, reduction=True,
                                   block_b=8, block_k=128))
    ref2 = _reference(logits2, targets2, 0.1, True)
    assert jnp.allclose(out2, ref2, rtol=1e-4, atol=1e-4), (out2, ref2)

    out2v = jax.block_until_ready(
        cross_entropy_label_smooth(logits2, targets2, epsilon=0.1, reduction=False,
                                   block_b=8, block_k=128))
    ref2v = _reference(logits2, targets2, 0.1, False)
    assert jnp.allclose(out2v, ref2v, rtol=1e-4, atol=1e-4), (out2v, ref2v)

    # bf16 logits accepted at the call boundary (halves HBM read traffic).
    logits_bf = logits2.astype(jnp.bfloat16)
    out_bf = jax.block_until_ready(
        cross_entropy_label_smooth(logits_bf, targets2, epsilon=0.1, reduction=True,
                                   block_b=8, block_k=128))
    ref_bf = _reference(logits_bf, targets2, 0.1, True)
    assert jnp.allclose(out_bf, ref_bf, rtol=1e-4, atol=1e-4), (out_bf, ref_bf)

    print("KERNEL_OK")
</pallas_src>

<mosaic_0001>
module attributes {stable_mosaic.version = 11 : i64} {
  func.func @_ce_label_smooth_kernel(%arg0: i32, %arg1: i32, %arg2: memref<8x32xf32, #tpu.memory_space<vmem>>, %arg3: memref<8x1xi32, #tpu.memory_space<vmem>>, %arg4: memref<8x1xf32, #tpu.memory_space<vmem>>, %arg5: memref<8x1xf32, #tpu.memory_space<vmem>>, %arg6: memref<8x1xf32, #tpu.memory_space<vmem>>, %arg7: memref<8x1xf32, #tpu.memory_space<vmem>>, %arg8: memref<8x1xf32, #tpu.memory_space<vmem>>) attributes {dimension_semantics = [#tpu.dimension_semantics<parallel>, #tpu.dimension_semantics<arbitrary>], iteration_bounds = array<i64: 1, 1>, scalar_prefetch = 0 : i64, scratch_operands = 4 : i64, tpu.core_type = #tpu.core_type<tc>, window_params = [{transform_indices = @transform_0, window_bounds = array<i64: 8, 32>}, {transform_indices = @transform_1, window_bounds = array<i64: 8, 1>}, {transform_indices = @transform_2, window_bounds = array<i64: 8, 1>}]} {
    %c0_i32 = arith.constant 0 : i32
    %0 = arith.cmpi eq, %arg1, %c0_i32 : i32
    %1 = arith.extui %0 : i1 to i32
    %c0_i32_0 = arith.constant 0 : i32
    %2 = arith.cmpi ne, %1, %c0_i32_0 : i32
    scf.if %2 {
      %cst_26 = arith.constant 0xFF800000 : f32
      %42 = vector.broadcast %cst_26 : f32 to vector<8x1xf32>
      %c0_27 = arith.constant 0 : index
      %c0_28 = arith.constant 0 : index
      %43 = vector.load %arg5[%c0_27, %c0_28] : memref<8x1xf32, #tpu.memory_space<vmem>>, vector<8x1xf32>
      tpu.vector_store %arg5[%c0_27, %c0_28], %42 {strides = array<i32>} : memref<8x1xf32, #tpu.memory_space<vmem>>, vector<8x1xf32>,
      %cst_29 = arith.constant 0.000000e+00 : f32
      %44 = vector.broadcast %cst_29 : f32 to vector<8x1xf32>
      %c0_30 = arith.constant 0 : index
      %c0_31 = arith.constant 0 : index
      %45 = vector.load %arg6[%c0_30, %c0_31] : memref<8x1xf32, #tpu.memory_space<vmem>>, vector<8x1xf32>
      tpu.vector_store %arg6[%c0_30, %c0_31], %44 {strides = array<i32>} : memref<8x1xf32, #tpu.memory_space<vmem>>, vector<8x1xf32>,
      %cst_32 = arith.constant 0.000000e+00 : f32
      %46 = vector.broadcast %cst_32 : f32 to vector<8x1xf32>
      %c0_33 = arith.constant 0 : index
      %c0_34 = arith.constant 0 : index
      %47 = vector.load %arg7[%c0_33, %c0_34] : memref<8x1xf32, #tpu.memory_space<vmem>>, vector<8x1xf32>
      tpu.vector_store %arg7[%c0_33, %c0_34], %46 {strides = array<i32>} : memref<8x1xf32, #tpu.memory_space<vmem>>, vector<8x1xf32>,
      %cst_35 = arith.constant 0.000000e+00 : f32
      %48 = vector.broadcast %cst_35 : f32 to vector<8x1xf32>
      %c0_36 = arith.constant 0 : index
      %c0_37 = arith.constant 0 : index
      %49 = vector.load %arg8[%c0_36, %c0_37] : memref<8x1xf32, #tpu.memory_space<vmem>>, vector<8x1xf32>
      tpu.vector_store %arg8[%c0_36, %c0_37], %48 {strides = array<i32>} : memref<8x1xf32, #tpu.memory_space<vmem>>, vector<8x1xf32>,
    } else {
    }
    %c0 = arith.constant 0 : index
    %c0_1 = arith.constant 0 : index
    %3 = vector.load %arg2[%c0, %c0_1] : memref<8x32xf32, #tpu.memory_space<vmem>>, vector<8x32xf32>
    %c0_2 = arith.constant 0 : index
    %c0_3 = arith.constant 0 : index
    %4 = vector.load %arg3[%c0_2, %c0_3] : memref<8x1xi32, #tpu.memory_space<vmem>>, vector<8x1xi32>
    %c32_i32 = arith.constant 32 : i32
    %5 = arith.muli %arg1, %c32_i32 : i32
    %6 = vector.broadcast %5 : i32 to vector<8x1xi32>
    %7 = arith.subi %4, %6 : vector<8x1xi32>
    %8 = tpu.iota {dimensions = array<i32: 1>} : vector<8x32xi32>
    %c0_4 = arith.constant 0 : index
    %c0_5 = arith.constant 0 : index
    %9 = vector.load %arg5[%c0_4, %c0_5] : memref<8x1xf32, #tpu.memory_space<vmem>>, vector<8x1xf32>
    %cst = arith.constant dense<0xFF800000> : vector<8xf32>
    %10 = vector.multi_reduction <maximumf>, %3, %cst [1] : vector<8x32xf32> to vector<8xf32>
    %11 = vector.shape_cast %10 : vector<8xf32> to vector<8x1xf32>
    %12 = arith.maximumf %9, %11 : vector<8x1xf32>
    %13 = arith.subf %9, %12 : vector<8x1xf32>
    %14 = math.exp %13 : vector<8x1xf32>
    %15 = vector.broadcast %12 : vector<8x1xf32> to vector<8x32xf32>
    %16 = arith.subf %3, %15 : vector<8x32xf32>
    %17 = math.exp %16 : vector<8x32xf32>
    %c0_6 = arith.constant 0 : index
    %c0_7 = arith.constant 0 : index
    %18 = vector.load %arg6[%c0_6, %c0_7] : memref<8x1xf32, #tpu.memory_space<vmem>>, vector<8x1xf32>
    %19 = arith.mulf %14, %18 : vector<8x1xf32>
    %cst_8 = arith.constant dense<0.000000e+00> : vector<8xf32>
    %20 = vector.multi_reduction <add>, %17, %cst_8 [1] : vector<8x32xf32> to vector<8xf32>
    %21 = vector.shape_cast %20 : vector<8xf32> to vector<8x1xf32>
    %22 = arith.addf %19, %21 : vector<8x1xf32>
    %c0_9 = arith.constant 0 : index
    %c0_10 = arith.constant 0 : index
    %23 = vector.load %arg6[%c0_9, %c0_10] : memref<8x1xf32, #tpu.memory_space<vmem>>, vector<8x1xf32>
    tpu.vector_store %arg6[%c0_9, %c0_10], %22 {strides = array<i32>} : memref<8x1xf32, #tpu.memory_space<vmem>>, vector<8x1xf32>,
    %c0_11 = arith.constant 0 : index
    %c0_12 = arith.constant 0 : index
    %24 = vector.load %arg5[%c0_11, %c0_12] : memref<8x1xf32, #tpu.memory_space<vmem>>, vector<8x1xf32>
    tpu.vector_store %arg5[%c0_11, %c0_12], %12 {strides = array<i32>} : memref<8x1xf32, #tpu.memory_space<vmem>>, vector<8x1xf32>,
    %c0_13 = arith.constant 0 : index
    %c0_14 = arith.constant 0 : index
    %25 = vector.load %arg7[%c0_13, %c0_14] : memref<8x1xf32, #tpu.memory_space<vmem>>, vector<8x1xf32>
    %cst_15 = arith.constant dense<0.000000e+00> : vector<8xf32>
    %26 = vector.multi_reduction <add>, %3, %cst_15 [1] : vector<8x32xf32> to vector<8xf32>
    %27 = vector.shape_cast %26 : vector<8xf32> to vector<8x1xf32>
    %28 = arith.addf %25, %27 : vector<8x1xf32>
    %c0_16 = arith.constant 0 : index
    %c0_17 = arith.constant 0 : index
    %29 = vector.load %arg7[%c0_16, %c0_17] : memref<8x1xf32, #tpu.memory_space<vmem>>, vector<8x1xf32>
    tpu.vector_store %arg7[%c0_16, %c0_17], %28 {strides = array<i32>} : memref<8x1xf32, #tpu.memory_space<vmem>>, vector<8x1xf32>,
    %c0_18 = arith.constant 0 : index
    %c0_19 = arith.constant 0 : index
    %30 = vector.load %arg8[%c0_18, %c0_19] : memref<8x1xf32, #tpu.memory_space<vmem>>, vector<8x1xf32>
    %31 = vector.broadcast %7 : vector<8x1xi32> to vector<8x32xi32>
    %32 = arith.cmpi eq, %8, %31 : vector<8x32xi32>
    %cst_20 = arith.constant 0.000000e+00 : f32
    %33 = vector.broadcast %cst_20 : f32 to vector<8x32xf32>
    %34 = arith.select %32, %3, %33 : vector<8x32xi1>, vector<8x32xf32>
    %cst_21 = arith.constant dense<0.000000e+00> : vector<8xf32>
    %35 = vector.multi_reduction <add>, %34, %cst_21 [1] : vector<8x32xf32> to vector<8xf32>
    %36 = vector.shape_cast %35 : vector<8xf32> to vector<8x1xf32>
    %37 = arith.addf %30, %36 : vector<8x1xf32>
    %c0_22 = arith.constant 0 : index
    %c0_23 = arith.constant 0 : index
    %38 = vector.load %arg8[%c0_22, %c0_23] : memref<8x1xf32, #tpu.memory_space<vmem>>, vector<8x1xf32>
    tpu.vector_store %arg8[%c0_22, %c0_23], %37 {strides = array<i32>} : memref<8x1xf32, #tpu.memory_space<vmem>>, vector<8x1xf32>,
    %c0_i32_24 = arith.constant 0 : i32
    %39 = arith.cmpi eq, %arg1, %c0_i32_24 : i32
    %40 = arith.extui %39 : i1 to i32
    %c0_i32_25 = arith.constant 0 : i32
    %41 = arith.cmpi ne, %40, %c0_i32_25 : i32
    scf.if %41 {
      %c0_26 = arith.constant 0 : index
      %c0_27 = arith.constant 0 : index
      %42 = vector.load %arg5[%c0_26, %c0_27] : memref<8x1xf32, #tpu.memory_space<vmem>>, vector<8x1xf32>
      %c0_28 = arith.constant 0 : index
      %c0_29 = arith.constant 0 : index
      %43 = vector.load %arg6[%c0_28, %c0_29] : memref<8x1xf32, #tpu.memory_space<vmem>>, vector<8x1xf32>
      %44 = math.log %43 : vector<8x1xf32>
      %45 = arith.addf %42, %44 : vector<8x1xf32>
      %c0_30 = arith.constant 0 : index
      %c0_31 = arith.constant 0 : index
      %46 = vector.load %arg8[%c0_30, %c0_31] : memref<8x1xf32, #tpu.memory_space<vmem>>, vector<8x1xf32>
      %cst_32 = arith.constant 0.899999976 : f32
      %47 = vector.broadcast %cst_32 : f32 to vector<8x1xf32>
      %48 = arith.mulf %47, %46 : vector<8x1xf32>
      %49 = arith.subf %45, %48 : vector<8x1xf32>
      %c0_33 = arith.constant 0 : index
      %c0_34 = arith.constant 0 : index
      %50 = vector.load %arg7[%c0_33, %c0_34] : memref<8x1xf32, #tpu.memory_space<vmem>>, vector<8x1xf32>
      %cst_35 = arith.constant 3.125000e-03 : f32
      %51 = vector.broadcast %cst_35 : f32 to vector<8x1xf32>
      %52 = arith.mulf %51, %50 : vector<8x1xf32>
      %53 = arith.subf %49, %52 : vector<8x1xf32>
      %c0_36 = arith.constant 0 : index
      %c0_37 = arith.constant 0 : index
      %54 = vector.load %arg4[%c0_36, %c0_37] : memref<8x1xf32, #tpu.memory_space<vmem>>, vector<8x1xf32>
      tpu.vector_store %arg4[%c0_36, %c0_37], %53 {strides = array<i32>} : memref<8x1xf32, #tpu.memory_space<vmem>>, vector<8x1xf32>,
    } else {
    }
    return
  }
  func.func @transform_0(%arg0: i32, %arg1: i32) -> (i32, i32) {
    %c0_i32 = arith.constant 0 : i32
    return %arg0, %arg1 : i32, i32
  }
  func.func @transform_1(%arg0: i32, %arg1: i32) -> (i32, i32) {
    %c0_i32 = arith.constant 0 : i32
    %c0_i32_0 = arith.constant 0 : i32
    return %arg0, %c0_i32 : i32, i32
  }
  func.func @transform_2(%arg0: i32, %arg1: i32) -> (i32, i32) {
    %c0_i32 = arith.constant 0 : i32
    %c0_i32_0 = arith.constant 0 : i32
    return %arg0, %c0_i32 : i32, i32
  }
}

</mosaic_0001>

<bundles_post_ra>
// kernel: tpu_custom_call.1
= control target key start
LH: loop header
LB: loop body
LE: loop exit
PB: predicated region body
PF: predicated region fallthrough
CT: control target
= control target key end

     0   :  { %vm28_vm0 = vcmask 261120   ;;  %vm15_vm1 = vcmask 7168   ;;  %v100_v1 = vmov -inf   ;;  %v101_v3 = vmov 0   ;;  %s140_s0 = inlined_call_operand.vmem [shape: f32[8,32], index: 0, kind: input, shape index: {}]   ;;  %s141_s1 = inlined_call_operand.vmem [shape: s32[8,1], index: 1, kind: input, shape index: {}]   ;;  %s142_s2 = inlined_call_operand.vmem [shape: f32[8,1], index: 2, kind: output, shape index: {}]  }
   0x1   :  { %v20_v0 = vld [vmem:[%s140_s0] sm:$0xff]  ;;  %16 = vst.msk [vmem:[#allocation2] sm:$0xff] %vm15_vm1, %v100_v1  ;;  %92 = vset.pattern.permute.xlu0 %v101_v3  ;;  %93 = vset.pattern.permute.xlu1 %v101_v3  ;;  %v102_v5 = vmov 0.0   ;;  %v25_v13 = vlaneseq }
   0x2   :  { %v29_v2 = vsel %vm28_vm0, %v20_v0, -inf  ;;  %v21_v4 = vld [vmem:[%s141_s1] sm:$0xff]  ;;  %17 = vst.msk [vmem:[#allocation3] sm:$0xff] %vm15_vm1, %v102_v5  ;;  %18 = vst.msk [vmem:[#allocation4] sm:$0xff] %vm15_vm1, %v102_v5  ;;  %v54_v20 = vsel %vm28_vm0, %v20_v0, 0.0 }
   0x3   :  { %30 = vmax.xlane.f32.xlu0 %v29_v2  ;;  %61 = vperm.xlu1 %93, %v21_v4   ;;  %19 = vst.msk [vmem:[#allocation5] sm:$0xff] %vm15_vm1, %v102_v5  ;;  %v26_v14 = vand.u32 127, %v25_v13 }
   0x8   :  { %v27_v6 = vld [vmem:[#allocation2] sm:$0xff] }
   0x9   :  { %v44_v23 = vld [vmem:[#allocation3] sm:$0xff]  ;;  %v53_v30 = vld [vmem:[#allocation4] sm:$0xff] }
   0xa   :  { %v59_v27 = vld [vmem:[#allocation5] sm:$0xff] }
  0x7e   :  { %v62_v15 = vpop.permute.xlu1 %61 }
  0x7f   :  { %vm63_vm2 = vcmp.eq.s32.totalorder %v26_v14, %v62_v15 }
  0x80   :  { %v64_v17 = vsel %vm63_vm2, %v20_v0, 0.0 }
  0x81   :  { %v65_v19 = vsel %vm28_vm0, %v64_v17, 0.0 }
  0x8c   :  { %v31_v7 = vpop.xlane.xlu0 %30 }
  0x8d   :  { %v32_v8 = vmax.f32 %v27_v6, %v31_v7 }
  0x8f   :  { %v33_v9 = vsub.f32 %v27_v6, %v32_v8  ;;  %52 = vst.msk [vmem:[#allocation2] sm:$0xff] %vm15_vm1, %v32_v8  ;;  %38 = vperm.xlu0 %92, %v32_v8  }
  0x91   :  { %v34_v21 = vmul.f32 1.442695, %v33_v9 }
  0x96   :  { %v73_v38 = vld [vmem:[#allocation2] sm:$0xff] }
 0x10a   :  { %v39_v10 = vpop.permute.xlu0 %38 }
 0x10b   :  { %v41_v11 = vsub.f32 %v20_v0, %v39_v10 }
 0x10d   :  { %v42_v12 = vmul.f32 1.442695, %v41_v11 }
 0x10f   :  { %94 = vpow2.f32 %v42_v12 }
 0x110   :  { %96 = vpow2.f32 %v34_v21 }
 0x11c   :  { %v95_v16 = vpop.eup %94 }
 0x11d   :  { %v46_v18 = vsel %vm28_vm0, %v95_v16, 0.0  ;;  %v97_v22 = vpop.eup %96 }
 0x11e   :  { %47 = vadd.xlane.f32.xlu1 %v46_v18  ;;  %v45_v24 = vmul.f32 %v97_v22, %v44_v23 }
 0x122   :  { %66 = vadd.xlane.f32.xlu1 %v65_v19 }
 0x126   :  { %55 = vadd.xlane.f32.xlu1 %v54_v20 }
 0x1a7   :  { %v48_v25 = vpop.xlane.xlu1 %47 }
 0x1a8   :  { %v49_v26 = vadd.f32 %v48_v25, %v45_v24 }
 0x1aa   :  { %51 = vst.msk [vmem:[#allocation3] sm:$0xff] %vm15_vm1, %v49_v26 }
 0x1ab   :  { %v67_v28 = vpop.xlane.xlu1 %66 }
 0x1ac   :  { %v68_v29 = vadd.f32 %v67_v28, %v59_v27 }
 0x1ae   :  { %69 = vst.msk [vmem:[#allocation5] sm:$0xff] %vm15_vm1, %v68_v29 }
 0x1af   :  { %v56_v31 = vpop.xlane.xlu1 %55 }
 0x1b0   :  { %v57_v32 = vadd.f32 %v56_v31, %v53_v30 }
 0x1b1   :  { %v74_v33 = vld [vmem:[#allocation3] sm:$0xff] }
 0x1b2   :  { %98 = vlog2.f32 %v74_v33  ;;  %58 = vst.msk [vmem:[#allocation4] sm:$0xff] %vm15_vm1, %v57_v32 }
 0x1b5   :  { %v78_v35 = vld [vmem:[#allocation5] sm:$0xff] }
 0x1b6   :  { %v79_v40 = vmul.f32 0.9, %v78_v35 }
 0x1b9   :  { %v81_v36 = vld [vmem:[#allocation4] sm:$0xff] }
 0x1ba   :  { %v82_v41 = vmul.f32 0.003125, %v81_v36 }
 0x1bf   :  { %v99_v34 = vpop.eup %98 }
 0x1c0   :  { %v76_v37 = vmul.f32 0.6931472, %v99_v34 }
 0x1c2   :  { %v77_v39 = vadd.f32 %v76_v37, %v73_v38 }
 0x1c4   :  { %v80_v42 = vsub.f32 %v77_v39, %v79_v40 }
 0x1c6   :  { %v83_v43 = vsub.f32 %v80_v42, %v82_v41 }
 0x1c8   :  { %84 = vst.msk [vmem:[%s142_s2] sm:$0xff] %vm15_vm1, %v83_v43 }

</bundles_post_ra>
